<compile_context>
chip_gen: v7x
topology: tpu7x:2x2x1
jax: 0.10.0
libtpu: 0.0.40
codegen_flags: <defaults>
</compile_context>

<pallas_src>
import functools
import math

import jax
import jax.numpy as jnp
from jax.experimental import pallas as pl
from jax.experimental.pallas import tpu as pltpu

TWO_PI = 2.0 * math.pi

_LANES = 128
_SUBLANES = 8
# ~2 MiB output block => ~4 MiB double-buffered output + ~4 MiB (lane-padded) x blocks
# + a few block-sized elementwise temporaries -- comfortably inside the 32 MiB scoped
# VMEM we request below (32 MiB is <= the physical VMEM on v5e/v6e/v7x).
_TARGET_BLOCK_BYTES = 2 << 20
_MIN_SPLIT_BYTES = 1 << 20       # split a single block in two only if each half >= ~1 MiB
_VMEM_LIMIT_BYTES = 32 << 20


def _round_up(n, m):
    return ((n + m - 1) // m) * m


def _pick_row_tile(total_rows, row_bytes, target_block_bytes):
    """Sublane-aligned row tile whose output block is ~target_block_bytes."""
    tb = max(_SUBLANES, (target_block_bytes // max(row_bytes, 1)) // _SUBLANES * _SUBLANES)
    if tb >= total_rows:
        if total_rows * row_bytes >= 2 * _MIN_SPLIT_BYTES:
            # Enough work to amortize the ~0.35us/step cost twice: use >= 2 grid steps
            # so ("parallel",) can shard across both TensorCores on v7x.
            tb = min(total_rows, _round_up(pl.cdiv(total_rows, 2), _SUBLANES))
        else:
            tb = total_rows          # single full block (block == full dim is always legal)
    return tb


def _packed_kernel(x_ref, w_ref, o_ref, *, half_dim, group):
    # x_ref: (R, group)  -- `group` consecutive batch elements per packed row
    # w_ref: (1, L)      -- w_ref[0, c] == weights[c % half_dim]
    # o_ref: (R, L)      -- L = group * 2 * half_dim  (lane-dense, <= 128 lanes)
    R = x_ref.shape[0]
    L = o_ref.shape[1]
    dim = 2 * half_dim

    w = w_ref[...] * TWO_PI                                   # fold 2*pi in-kernel (tiny (1,L) op)
    lane = jax.lax.broadcasted_iota(jnp.int32, (1, L), 1)

    # Spread x across lane groups: lanes [j*dim, (j+1)*dim) carry batch element j of the row.
    xs = jnp.broadcast_to(x_ref[:, 0:1], (R, L))
    for j in range(1, group):                                 # static unroll, group <= 64
        xj = jnp.broadcast_to(x_ref[:, j:j + 1], (R, L))
        xs = jnp.where(lane >= j * dim, xj, xs)

    freqs = xs * w                                            # (R, L) fully lane-dense
    sin_lane = (lane % dim) < half_dim                        # first half of each group -> sin
    o_ref[...] = jnp.where(sin_lane, jnp.sin(freqs), jnp.cos(freqs))


def _flat_kernel(x_ref, w_ref, o_ref, *, half_dim):
    # Fallback for dim > 128 (already lane-dense there).
    # x_ref: (R, 1) ; w_ref: (1, H) ; o_ref: (R, 2H)
    w = w_ref[...] * TWO_PI                                   # keep 2*pi fold in-kernel
    freqs = x_ref[...] * w                                    # (R, H) broadcast multiply
    o_ref[:, :half_dim] = jnp.sin(freqs)
    o_ref[:, half_dim:] = jnp.cos(freqs)                      # aligned whenever H % 128 == 0


def _packed_path(xf, wf, B, half_dim, target_block_bytes):
    dim = 2 * half_dim
    group = max(1, _LANES // dim)            # batch elements packed per lane row
    L = group * dim                          # packed lane width (== 128 when dim | 128)

    # Pad batch only up to a multiple of `group` (review #6); padded rows are sliced off.
    Bp = _round_up(B, group)
    if Bp != B:
        xf = jnp.pad(xf, (0, Bp - B))
    rows = Bp // group
    x2d = xf.reshape(rows, group)                       # free contiguous reshape
    w_row = jnp.tile(wf, 2 * group).reshape(1, L)       # layout plumbing only (2*pi stays in-kernel)

    tb = _pick_row_tile(rows, L * 4, target_block_bytes)
    grid = (pl.cdiv(rows, tb),)                         # ragged last block handled by Pallas

    out = pl.pallas_call(
        functools.partial(_packed_kernel, half_dim=half_dim, group=group),
        out_shape=jax.ShapeDtypeStruct((rows, L), jnp.float32),
        grid=grid,
        in_specs=[
            pl.BlockSpec((tb, group), lambda i: (i, 0)),    # x tiles over packed batch rows
            pl.BlockSpec((1, L), lambda i: (0, 0)),         # tiled weights resident
        ],
        out_specs=pl.BlockSpec((tb, L), lambda i: (i, 0)),
        compiler_params=pltpu.CompilerParams(
            dimension_semantics=("parallel",),              # 2x on v7x's dual TensorCores
            vmem_limit_bytes=_VMEM_LIMIT_BYTES),
    )(x2d, w_row)

    out = out.reshape(Bp, dim)                              # free: contiguous split/merge
    return out[:B] if Bp != B else out


def _flat_path(xf, wf, B, half_dim, target_block_bytes):
    dim = 2 * half_dim
    x2d = xf.reshape(B, 1)
    w2d = wf.reshape(1, half_dim)

    tb = _pick_row_tile(B, dim * 4, target_block_bytes)
    grid = (pl.cdiv(B, tb),)                                # ragged last block, no batch padding

    return pl.pallas_call(
        functools.partial(_flat_kernel, half_dim=half_dim),
        out_shape=jax.ShapeDtypeStruct((B, dim), jnp.float32),
        grid=grid,
        in_specs=[
            pl.BlockSpec((tb, 1), lambda i: (i, 0)),
            pl.BlockSpec((1, half_dim), lambda i: (0, 0)),
        ],
        out_specs=pl.BlockSpec((tb, dim), lambda i: (i, 0)),
        compiler_params=pltpu.CompilerParams(
            dimension_semantics=("parallel",),
            vmem_limit_bytes=_VMEM_LIMIT_BYTES),
    )(x2d, w2d)


def learned_sinusoidal_pos_emb(x, weights, *, target_block_bytes=_TARGET_BLOCK_BYTES):
    """x: (B,) float, weights: (half_dim,) float -> (B, 2*half_dim) float32."""
    assert x.ndim == 1 and weights.ndim == 1
    B = int(x.shape[0])
    half_dim = int(weights.shape[0])
    xf = x.astype(jnp.float32)
    wf = weights.astype(jnp.float32)
    if 2 * half_dim <= _LANES:
        return _packed_path(xf, wf, B, half_dim, target_block_bytes)
    return _flat_path(xf, wf, B, half_dim, target_block_bytes)


def reference(x, weights):
    freqs = x[:, None].astype(jnp.float32) * weights[None, :].astype(jnp.float32) * TWO_PI
    return jnp.concatenate([jnp.sin(freqs), jnp.cos(freqs)], axis=-1)


if __name__ == "__main__":
    key = jax.random.PRNGKey(0)
    k_x, k_w, k_x2, k_x3, k_w3 = jax.random.split(key, 5)

    # Canonical small case: dim=32 (half_dim=16), batch=8 -> packed lane-dense path.
    dim = 32
    half_dim = dim // 2
    batch = 8
    weights = jax.random.normal(k_w, (half_dim,), dtype=jnp.float32)
    x = jax.random.normal(k_x, (batch,), dtype=jnp.float32)

    out = jax.block_until_ready(learned_sinusoidal_pos_emb(x, weights))
    ref = reference(x, weights)
    assert out.shape == (batch, dim)
    assert jnp.allclose(out, ref, atol=1e-5, rtol=1e-5)

    # Ragged multi-tile + padded-batch path (B=37 not a multiple of the pack factor,
    # tiny target block forces several grid steps with a ragged last block).
    x2 = jax.random.normal(k_x2, (37,), dtype=jnp.float32)
    out2 = jax.block_until_ready(
        learned_sinusoidal_pos_emb(x2, weights, target_block_bytes=2048))
    ref2 = reference(x2, weights)
    assert out2.shape == (37, dim)
    assert jnp.allclose(out2, ref2, atol=1e-5, rtol=1e-5)

    # dim > 128 fallback (flat, already lane-dense) path.
    weights3 = jax.random.normal(k_w3, (128,), dtype=jnp.float32)   # dim = 256
    x3 = jax.random.normal(k_x3, (16,), dtype=jnp.float32)
    out3 = jax.block_until_ready(learned_sinusoidal_pos_emb(x3, weights3))
    ref3 = reference(x3, weights3)
    assert out3.shape == (16, 256)
    assert jnp.allclose(out3, ref3, atol=1e-5, rtol=1e-5)

    print("KERNEL_OK")
</pallas_src>

<mosaic_0001>
module attributes {stable_mosaic.version = 11 : i64} {
  func.func @_packed_kernel(%arg0: i32, %arg1: memref<2x4xf32, #tpu.memory_space<vmem>>, %arg2: memref<1x128xf32, #tpu.memory_space<vmem>>, %arg3: memref<2x128xf32, #tpu.memory_space<vmem>>) attributes {dimension_semantics = [#tpu.dimension_semantics<parallel>], iteration_bounds = array<i64: 1>, scalar_prefetch = 0 : i64, scratch_operands = 0 : i64, tpu.core_type = #tpu.core_type<tc>, window_params = [{transform_indices = @transform_0, window_bounds = array<i64: 2, 4>}, {pipeline_mode = #tpu.pipeline_mode<synchronous>, transform_indices = @transform_1, window_bounds = array<i64: 1, 128>}, {transform_indices = @transform_2, window_bounds = array<i64: 2, 128>}]} {
    %c0 = arith.constant 0 : index
    %c0_0 = arith.constant 0 : index
    %0 = vector.load %arg2[%c0, %c0_0] : memref<1x128xf32, #tpu.memory_space<vmem>>, vector<1x128xf32>
    %cst = arith.constant 6.28318548 : f32
    %1 = vector.broadcast %cst : f32 to vector<1x128xf32>
    %2 = arith.mulf %0, %1 : vector<1x128xf32>
    %3 = tpu.iota {dimensions = array<i32: 1>} : vector<1x128xi32>
    %c0_1 = arith.constant 0 : index
    %c0_2 = arith.constant 0 : index
    %4 = vector.load %arg1[%c0_1, %c0_2] : memref<2x4xf32, #tpu.memory_space<vmem>>, vector<2x1xf32>
    %5 = vector.shape_cast %4 : vector<2x1xf32> to vector<2x1xf32>
    %6 = vector.broadcast %5 : vector<2x1xf32> to vector<2x128xf32>
    %c0_3 = arith.constant 0 : index
    %c1 = arith.constant 1 : index
    %7 = vector.load %arg1[%c0_3, %c1] : memref<2x4xf32, #tpu.memory_space<vmem>>, vector<2x1xf32>
    %8 = vector.shape_cast %7 : vector<2x1xf32> to vector<2x1xf32>
    %9 = vector.broadcast %8 : vector<2x1xf32> to vector<2x128xf32>
    %c32_i32 = arith.constant 32 : i32
    %10 = vector.broadcast %c32_i32 : i32 to vector<1x128xi32>
    %11 = arith.cmpi sge, %3, %10 : vector<1x128xi32>
    %12 = vector.shape_cast %11 : vector<1x128xi1> to vector<1x128xi1>
    %13 = vector.broadcast %12 : vector<1x128xi1> to vector<2x128xi1>
    %14 = arith.select %13, %9, %6 : vector<2x128xi1>, vector<2x128xf32>
    %c0_4 = arith.constant 0 : index
    %c2 = arith.constant 2 : index
    %15 = vector.load %arg1[%c0_4, %c2] : memref<2x4xf32, #tpu.memory_space<vmem>>, vector<2x1xf32>
    %16 = vector.shape_cast %15 : vector<2x1xf32> to vector<2x1xf32>
    %17 = vector.broadcast %16 : vector<2x1xf32> to vector<2x128xf32>
    %c64_i32 = arith.constant 64 : i32
    %18 = vector.broadcast %c64_i32 : i32 to vector<1x128xi32>
    %19 = arith.cmpi sge, %3, %18 : vector<1x128xi32>
    %20 = vector.shape_cast %19 : vector<1x128xi1> to vector<1x128xi1>
    %21 = vector.broadcast %20 : vector<1x128xi1> to vector<2x128xi1>
    %22 = arith.select %21, %17, %14 : vector<2x128xi1>, vector<2x128xf32>
    %c0_5 = arith.constant 0 : index
    %c3 = arith.constant 3 : index
    %23 = vector.load %arg1[%c0_5, %c3] : memref<2x4xf32, #tpu.memory_space<vmem>>, vector<2x1xf32>
    %24 = vector.shape_cast %23 : vector<2x1xf32> to vector<2x1xf32>
    %25 = vector.broadcast %24 : vector<2x1xf32> to vector<2x128xf32>
    %c96_i32 = arith.constant 96 : i32
    %26 = vector.broadcast %c96_i32 : i32 to vector<1x128xi32>
    %27 = arith.cmpi sge, %3, %26 : vector<1x128xi32>
    %28 = vector.shape_cast %27 : vector<1x128xi1> to vector<1x128xi1>
    %29 = vector.broadcast %28 : vector<1x128xi1> to vector<2x128xi1>
    %30 = arith.select %29, %25, %22 : vector<2x128xi1>, vector<2x128xf32>
    %31 = vector.broadcast %2 : vector<1x128xf32> to vector<2x128xf32>
    %32 = arith.mulf %30, %31 : vector<2x128xf32>
    %c32_i32_6 = arith.constant 32 : i32
    %c0_i32 = arith.constant 0 : i32
    %33 = arith.cmpi eq, %c32_i32_6, %c0_i32 : i32
    %c1_i32 = arith.constant 1 : i32
    %34 = arith.select %33, %c1_i32, %c32_i32_6 : i32
    %35 = vector.broadcast %34 : i32 to vector<1x128xi32>
    %36 = arith.remsi %3, %35 : vector<1x128xi32>
    %c0_i32_7 = arith.constant 0 : i32
    %37 = vector.broadcast %c0_i32_7 : i32 to vector<1x128xi32>
    %38 = arith.cmpi ne, %36, %37 : vector<1x128xi32>
    %c0_i32_8 = arith.constant 0 : i32
    %39 = vector.broadcast %c0_i32_8 : i32 to vector<1x128xi32>
    %40 = arith.cmpi slt, %36, %39 : vector<1x128xi32>
    %c0_i32_9 = arith.constant 0 : i32
    %41 = arith.cmpi slt, %34, %c0_i32_9 : i32
    %42 = vector.broadcast %41 : i1 to vector<1x128xi1>
    %43 = vector.broadcast %42 : vector<1x128xi1> to vector<1x128xi1>
    %44 = arith.xori %40, %43 : vector<1x128xi1>
    %45 = arith.andi %44, %38 : vector<1x128xi1>
    %46 = vector.broadcast %34 : i32 to vector<1x128xi32>
    %47 = arith.addi %36, %46 : vector<1x128xi32>
    %48 = arith.select %45, %47, %36 : vector<1x128xi1>, vector<1x128xi32>
    %c16_i32 = arith.constant 16 : i32
    %49 = vector.broadcast %c16_i32 : i32 to vector<1x128xi32>
    %50 = arith.cmpi slt, %48, %49 : vector<1x128xi32>
    %51 = math.sin %32 : vector<2x128xf32>
    %52 = math.cos %32 : vector<2x128xf32>
    %53 = vector.shape_cast %50 : vector<1x128xi1> to vector<1x128xi1>
    %54 = vector.broadcast %53 : vector<1x128xi1> to vector<2x128xi1>
    %55 = arith.select %54, %51, %52 : vector<2x128xi1>, vector<2x128xf32>
    %c0_10 = arith.constant 0 : index
    %c0_11 = arith.constant 0 : index
    %56 = vector.load %arg3[%c0_10, %c0_11] : memref<2x128xf32, #tpu.memory_space<vmem>>, vector<2x128xf32>
    tpu.vector_store %arg3[%c0_10, %c0_11], %55 {strides = array<i32>} : memref<2x128xf32, #tpu.memory_space<vmem>>, vector<2x128xf32>,
    return
  }
  func.func @transform_0(%arg0: i32) -> (i32, i32) {
    %c0_i32 = arith.constant 0 : i32
    %c0_i32_0 = arith.constant 0 : i32
    return %arg0, %c0_i32 : i32, i32
  }
  func.func @transform_1(%arg0: i32) -> (i32, i32) {
    %c0_i32 = arith.constant 0 : i32
    %c0_i32_0 = arith.constant 0 : i32
    %c0_i32_1 = arith.constant 0 : i32
    return %c0_i32, %c0_i32_0 : i32, i32
  }
  func.func @transform_2(%arg0: i32) -> (i32, i32) {
    %c0_i32 = arith.constant 0 : i32
    %c0_i32_0 = arith.constant 0 : i32
    return %arg0, %c0_i32 : i32, i32
  }
}

</mosaic_0001>

<bundles_post_ra>
// kernel: tpu_custom_call.1
= control target key start
LH: loop header
LB: loop body
LE: loop exit
PB: predicated region body
PF: predicated region fallthrough
CT: control target
= control target key end

     0   :  { %7 = vsyncpa [#allocation3], 0  ;;  %s472_s0 = inlined_call_operand.hbm [shape: f32[2,4], index: 0, kind: input, shape index: {}]   ;;  %s473_s1 = inlined_call_operand.vmem [shape: f32[1,128], index: 1, kind: input, shape index: {}]   ;;  %s474_s2 = inlined_call_operand.hbm [shape: f32[2,128], index: 2, kind: output, shape index: {}]  }
   0x1   :  { %8 = vsyncpa [#allocation4], 0  ;;  %s385_s9 = smov [#allocation2]   ;;  %s337_s13 = scalar_lea.hbm %s472_s0, 32 }
   0x2   :  { %s15_s10 = sshll.u32 %s385_s9, 4  ;;  %p338_p0 = scmp.ne.s32.totalorder %s472_s0, %s337_s13  ;;  %s16_s10 = int_to_ptr.vmem [resolvable:$true] %s15_s10 }
   0x3   :  { %p341_p1 = scmp.lt.u32.totalorder %s337_s13, %s472_s0 }
   0x5   :  { %p343_p2 = pnand %p341_p1, %p338_p0 }
   0x7   :  { %346 = shalt.err (!%p343_p2)
}
   0x8   :  { %s347_s18 = scalar_lea.vmem %s16_s10, 32  ;;  %p352_p4 = scmp.lt.s32.totalorder %s16_s10, %s16_s10 }
   0x9   :  { %p348_p3 = scmp.ne.s32.totalorder %s16_s10, %s347_s18  ;;  %p353_p5 = scmp.lt.s32.totalorder %s347_s18, %s347_s18 }
   0xb   :  { %p354_p6 = por %p353_p5, %p352_p4 }
   0xd   :  { %p355_p7 = pnand %p354_p6, %p348_p3 }
   0xf   :  { %358 = shalt.err (!%p355_p7)
}
  0x10   :  { %18 = dma.hbm_to_vmem [thread:$0]  %s472_s0, 32, %s16_s10, [#allocation3]  }
  0x11   :  { %381 = dma.done.wait [#allocation3], 32  }
  0x12   :  { %382 = vsyncadd [#allocation3], 4294967264  ;;  %v386_v0 = vmov 0   ;;  %v387_v1 = vmov 2   ;;  %v28_v2 = vld [vmem:[#allocation2] sm:$0x3]  ;;  %v26_v5 = vlaneseq }
  0x13   :  { %328 = vset.pattern.permute.xlu0 %v386_v0  ;;  %330 = vset.pattern.permute.xlu1 %v387_v1  ;;  %v388_v3 = vmov 1   ;;  %v389_v4 = vmov 3   ;;  %v24_v7 = vld [vmem:[%s473_s1] sm:$0x1]  ;;  %v390_v30 = vmov 683565275  }
  0x14   :  { %31 = vperm.xlu0 %328, %v28_v2   ;;  %43 = vperm.xlu1 %330, %v28_v2   ;;  %v60_v6 = vshrl.u32 %v26_v5, 7  ;;  %v427_v8 = vand.u32 127, %v26_v5  ;;  %v25_v12 = vmul.f32 6.2831855, %v24_v7  ;;  %v391_v32 = vmov 2475754826  }
  0x15   :  { %v392_v35 = vmov 2131351028   ;;  %v393_v38 = vmov 2102212464   ;;  %v394_v41 = vmov 920167782  }
  0x16   :  { %v61_v11 = vsub.s32 0, %v60_v6  ;;  %vm38_vm0 = vcmp.ge.s32.totalorder %v427_v8, 32  ;;  %vm46_vm1 = vcmp.ge.s32.totalorder %v427_v8, 64  ;;  %vm54_vm2 = vcmp.ge.s32.totalorder %v427_v8, 96  ;;  %s396_s1 = smov [#allocation5]  }
  0x17   :  { %v395_v44 = vmov 1326507024   ;;  %s295_s22 = sshll.u32 %s396_s1, 4  ;;  %s296_s22 = int_to_ptr.vmem [resolvable:$true] %s295_s22 }
  0x18   :  { %329 = vset.pattern.permute.xlu0 %v388_v3  ;;  %331 = vset.pattern.permute.xlu1 %v389_v4  ;;  %v62_v15 = vrot.slane %v25_v12, %v61_v11  ;;  %s359_s23 = scalar_lea.vmem %s296_s22, 32  ;;  %p364_p9 = scmp.lt.s32.totalorder %s296_s22, %s296_s22 }
  0x19   :  { %35 = vperm.xlu0 %329, %v28_v2   ;;  %51 = vperm.xlu1 %331, %v28_v2   ;;  %p360_p8 = scmp.ne.s32.totalorder %s296_s22, %s359_s23  ;;  %p365_p10 = scmp.lt.s32.totalorder %s359_s23, %s359_s23 }
  0x1b   :  { %p366_p11 = por %p365_p10, %p364_p9 }
  0x1d   :  { %332 = vset.pattern.permute.xlu0 %v389_v4  ;;  %p367_p12 = pnand %p366_p11, %p360_p8 }
  0x93   :  { %v32_v9 = vpop.permute.xlu0 %31  ;;  %v44_v10 = vpop.permute.xlu1 %43 }
  0x98   :  { %v36_v13 = vpop.permute.xlu0 %35  ;;  %v52_v14 = vpop.permute.xlu1 %51 }
  0x99   :  { %v41_v16 = vsel %vm38_vm0, %v36_v13, %v32_v9 }
  0x9a   :  { %v49_v17 = vsel %vm46_vm1, %v44_v10, %v41_v16 }
  0x9b   :  { %v57_v18 = vsel %vm54_vm2, %v52_v14, %v49_v17 }
  0x9c   :  { %v432_v19 = vmul.f32 %v62_v15, %v57_v18 }
  0x9e   :  { %v81_v20 = vand.u32 2139095040, %v432_v19  ;;  %v78_v24 = vand.u32 2147483647, %v432_v19  ;;  %vm80_vm10 = vcmp.lt.s32.totalorder %v432_v19, 0 }
  0xa0   :  { %v82_v21 = vshrl.u32 %v81_v20, 23  ;;  %v85_v27 = vand.u32 8388607, %v78_v24  ;;  %vm79_vm11 = vcmp.le.f32.partialorder %v78_v24, 0.7853982 }
  0xa2   :  { %v304_v22 = vadd.s32 4294967169, %v82_v21  ;;  %v86_v46 = vor.u32 8388608, %v85_v27 }
  0xa4   :  { %v88_v23 = vadd.s32 1, %v304_v22  ;;  %v126_v60 = vshll.u32 %v86_v46, 8 }
  0xa6   :  { %vm89_vm3 = vcmp.gt.s32.totalorder %v88_v23, 0 }
  0xa7   :  { %v90_v25 = vsel %vm89_vm3, %v88_v23, 0  ;;  %vm170_vm3 = vweird.f32 %v432_v19 }
  0xa8   :  { %v92_v26 = vand.u32 31, %v90_v25  ;;  %v91_v29 = vshrl.u32 %v90_v25, 5 }
  0xaa   :  { %v93_v28 = vsub.s32 32, %v92_v26  ;;  %v95_v31 = vshll.u32 %v390_v30, %v92_v26  ;;  %v98_v33 = vshll.u32 %v391_v32, %v92_v26  ;;  %v101_v37 = vshll.u32 %v392_v35, %v92_v26 }
  0xab   :  { %v104_v40 = vshll.u32 %v393_v38, %v92_v26  ;;  %v107_v43 = vshll.u32 %v394_v41, %v92_v26  ;;  %vm110_vm4 = vcmp.lt.s32.totalorder %v91_v29, 1  ;;  %vm113_vm5 = vcmp.lt.s32.totalorder %v91_v29, 4 }
  0xac   :  { %v96_v34 = vshrl.u32 %v391_v32, %v93_v28  ;;  %v99_v36 = vshrl.u32 %v392_v35, %v93_v28  ;;  %v102_v39 = vshrl.u32 %v393_v38, %v93_v28  ;;  %v105_v42 = vshrl.u32 %v394_v41, %v93_v28 }
  0xad   :  { %v108_v45 = vshrl.u32 %v395_v44, %v93_v28  ;;  %v94_v55 = vshrl.u32 %v390_v30, %v93_v28  ;;  %vm112_vm6 = vcmp.lt.s32.totalorder %v91_v29, 3  ;;  %vm111_vm7 = vcmp.lt.s32.totalorder %v91_v29, 2 }
  0xae   :  { %v97_v47 = vor.u32 %v96_v34, %v95_v31  ;;  %v100_v48 = vor.u32 %v99_v36, %v98_v33  ;;  %v103_v49 = vor.u32 %v102_v39, %v101_v37  ;;  %v106_v50 = vor.u32 %v105_v42, %v104_v40 }
  0xaf   :  { %v109_v51 = vor.u32 %v108_v45, %v107_v43  ;;  %v69_v41 = vand.u32 31, %v427_v8 }
  0xb0   :  { %v115_v52 = vsel %vm113_vm5, %v103_v49, 2102212464  ;;  %v118_v53 = vsel %vm110_vm4, %v97_v47, %v100_v48  ;;  %v122_v54 = vsel %vm110_vm4, %v100_v48, %v103_v49  ;;  %v119_v56 = vsel %vm113_vm5, %v106_v50, 920167782 }
  0xb1   :  { %v123_v57 = vsel %vm113_vm5, %v109_v51, 1326507024  ;;  %v120_v58 = vsel %vm112_vm6, %v103_v49, %v119_v56  ;;  %v114_v61 = vsel %vm110_vm4, %v94_v55, %v97_v47  ;;  %v116_v62 = vsel %vm112_vm6, %v100_v48, %v115_v52 }
  0xb2   :  { %v124_v59 = vsel %vm112_vm6, %v106_v50, %v123_v57  ;;  %v121_v63 = vsel %vm111_vm7, %v118_v53, %v120_v58  ;;  %v117_v5 = vsel %vm111_vm7, %v114_v61, %v116_v62  ;;  %vm453_vm12 = vcmp.lt.s32.totalorder %v69_v41, 16 }
  0xb3   :  { %v125_v0 = vsel %vm111_vm7, %v122_v54, %v124_v59  ;;  %v441_v3 = vmul.u32.u64.low %v126_v60, %v121_v63  ;;  %v442_v4 = vmul.u32.u64.high %v126_v60, %v121_v63, %v441_v3  ;;  %v133_v7 = vmul.u32 %v126_v60, %v117_v5 }
  0xb4   :  { %v438_v1 = vmul.u32.u64.low %v126_v60, %v125_v0  ;;  %v439_v2 = vmul.u32.u64.high %v126_v60, %v125_v0, %v438_v1 }
  0xb5   :  { %v136_v6 = vadd.s32 1, %v442_v4 }
  0xb6   :  { %vm135_vm8 = vc.u32 %v439_v2, %v441_v3  ;;  %v134_v21 = vadd.s32 %v441_v3, %v439_v2 }
  0xb7   :  { %v137_v9 = vsel %vm135_vm8, %v136_v6, %v442_v4 }
  0xb8   :  { %v138_v10 = vadd.s32 %v137_v9, %v133_v7 }
  0xba   :  { %v139_v11 = vadd.s32 536870912, %v138_v10 }
  0xbc   :  { %v140_v12 = vshrl.u32 %v139_v11, 30 }
  0xbe   :  { %v141_v13 = vshll.u32 %v140_v12, 30  ;;  %v164_v34 = vsub.s32 4, %v140_v12 }
  0xc0   :  { %v142_v14 = vsub.s32 %v138_v10, %v141_v13  ;;  %v165_v37 = vsel %vm80_vm10, %v164_v34, %v140_v12 }
  0xc1   :  { %v167_v39 = vsel %vm79_vm11, 0, %v165_v37 }
  0xc2   :  { %v144_v15 = vsub.s32 0, %v142_v14  ;;  %v171_v40 = vadd.s32 3, %v167_v39  ;;  %v275_v43 = vand.u32 3, %v167_v39 }
  0xc4   :  { %v305_v16 = vmin.u32 %v144_v15, %v142_v14  ;;  %v172_v42 = vand.u32 3, %v171_v40  ;;  %vm280_vm14 = vcmp.eq.s32.totalorder %v275_v43, 2  ;;  %vm277_vm0 = vcmp.eq.s32.totalorder %v275_v43, 0 }
  0xc5   :  { %vm276_vm2 = vcmp.lt.s32.totalorder %v275_v43, 2 }
  0xc6   :  { %v146_v17 = vclz %v305_v16  ;;  %vm177_vm13 = vcmp.eq.s32.totalorder %v172_v42, 2  ;;  %vm174_vm15 = vcmp.eq.s32.totalorder %v172_v42, 0  ;;  %vm173_vm1 = vcmp.lt.s32.totalorder %v172_v42, 2 }
  0xc8   :  { %v306_v18 = vadd.s32 4294967294, %v146_v17 }
  0xca   :  { %vm307_vm9 = vcmp.lt.s32.totalorder %v306_v18, 0 }
  0xcb   :  { %v149_v20 = vsel %vm307_vm9, 0, %v306_v18 }
  0xcc   :  { %v150_v22 = vsub.s32 32, %v149_v20  ;;  %v154_v23 = vsub.s32 4294967266, %v149_v20  ;;  %v151_v25 = vshll.u32 %v142_v14, %v149_v20 }
  0xce   :  { %v152_v26 = vshrl.u32 %v134_v21, %v150_v22  ;;  %v155_v27 = vadd.s32 127, %v154_v23 }
  0xd0   :  { %v153_v28 = vor.u32 %v152_v26, %v151_v25  ;;  %v156_v29 = vshll.u32 %v155_v27, 23 }
  0xd2   :  { %v157_v30 = vor.u32 4788187, %v156_v29  ;;  %v160_v32 = vcvt.s32.f32 %v153_v28 }
  0xd4   :  { %v158_v31 = vand.u32 2147483647, %v157_v30 }
  0xd6   :  { %v161_v33 = vmul.f32 %v160_v32, %v158_v31 }
  0xd8   :  { %v162_v35 = vxor.u32 2147483648, %v161_v33 }
  0xda   :  { %v163_v36 = vsel %vm80_vm10, %v162_v35, %v161_v33 }
  0xdb   :  { %v166_v38 = vsel %vm79_vm11, %v432_v19, %v163_v36 }
  0xdc   :  { %333 = vcosq.f32 %v166_v38 }
  0xdd   :  { %335 = vsinq.f32 %v166_v38 }
  0xe6   :  { %v334_v44 = vpop.eup %333 }
  0xe7   :  { %v336_v45 = vpop.eup %335  ;;  %v178_v46 = vxor.u32 2147483648, %v334_v44 }
  0xe8   :  { %v175_v48 = vxor.u32 2147483648, %v336_v45 }
  0xe9   :  { %v179_v24 = vsel %vm177_vm13, %v178_v46, %v336_v45  ;;  %v282_v49 = vsel %vm280_vm14, %v178_v46, %v336_v45 }
  0xea   :  { %v176_v8 = vsel %vm174_vm15, %v334_v44, %v175_v48  ;;  %v279_v50 = vsel %vm277_vm0, %v334_v44, %v175_v48 }
  0xeb   :  { %v180_v51 = vsel %vm173_vm1, %v176_v8, %v179_v24  ;;  %v283_v52 = vsel %vm276_vm2, %v279_v50, %v282_v49 }
  0xec   :  { %v181_v53 = vsel %vm170_vm3, nan, %v180_v51  ;;  %v284_v54 = vsel %vm170_vm3, nan, %v283_v52 }
  0xed   :  { %v287_v55 = vsel %vm453_vm12, %v181_v53, %v284_v54 }
  0xee   :  { %288 = vst [vmem:[#allocation5] sm:$0x3] %v287_v55 }
  0xef   :  { %370 = shalt.err (!%p367_p12)
}
  0xf0   :  { %s371_s26 = scalar_lea.hbm %s474_s2, 32 }
  0xf1   :  { %p372_p13 = scmp.ne.s32.totalorder %s474_s2, %s371_s26  ;;  %p375_p0 = scmp.lt.u32.totalorder %s371_s26, %s474_s2 }
  0xf3   :  { %p377_p1 = pnand %p375_p0, %p372_p13 }
  0xf5   :  { %380 = shalt.err (!%p377_p1)
}
  0xf6   :  { %298 = dma.vmem_to_hbm [thread:$0]  %s296_s22, 32, %s474_s2, [#allocation4]  }
  0xf7   :  { %383 = dma.done.wait [#allocation4], 32  }
  0xf8   :  { %384 = vsyncadd [#allocation4], 4294967264 }
  0xf9   :  { %302 = vsyncpa [#allocation3], 1 }
  0xfa   :  { %303 = vsyncpa [#allocation4], 1 }

</bundles_post_ra>
